<compile_context>
chip_gen: v6e
topology: v6e:2x2x1
jax: 0.10.0
libtpu: 0.0.40
codegen_flags: <defaults>
</compile_context>

<pallas_src>
import numpy as np
import jax
import jax.numpy as jnp
from jax import lax
from jax.experimental import pallas as pl
from jax.experimental.pallas import tpu as pltpu


# ---------------------------------------------------------------------------
# helpers
# ---------------------------------------------------------------------------
def _pick_tile(n, candidates, min_tiles=1):
    for c in candidates:
        if c <= n and n % c == 0 and (n // c) >= min_tiles:
            return c
    return None


def _elementwise_dtype():
    """bf16 elementwise on v6e/v7x (bf16 VPU+EUP); f32 on v5e and older."""
    try:
        kind = jax.devices()[0].device_kind.lower()
    except Exception:
        return jnp.float32
    return jnp.bfloat16 if any(t in kind for t in ("v6", "v7")) else jnp.float32


# ---------------------------------------------------------------------------
# Kernel 1: fused per-head projection
#   h_aug = [x @ W | 1]  -> (tm, Fout+1)  bf16  (MXU operand downstream;
#                                               ones column gives the rowsum)
#   f     = h @ [a1; a2]^T -> (tm, 2)     f32   (feeds leakyrelu / exp)
#   W_aug / a_aug arrive zero-padded to Fout+1 columns, so the ones column is
#   produced with an iota/where instead of an unaligned lane concatenate.
# ---------------------------------------------------------------------------
def _proj_kernel(x_ref, w_ref, a_ref, h_ref, f_ref):
    h = jnp.dot(x_ref[...], w_ref[0], preferred_element_type=jnp.float32)  # (tm, Fout+1)
    # last column of h is exactly 0 (W_aug padded), so it contributes nothing here
    f_ref[0] = lax.dot_general(h, a_ref[0], (((1,), (1,)), ((), ())),
                               preferred_element_type=jnp.float32)          # (tm, 2)
    fout = h.shape[1] - 1
    is_ones_col = lax.broadcasted_iota(jnp.int32, h.shape, 1) == fout
    h_ref[0] = jnp.where(is_ones_col, 1.0, h).astype(h_ref.dtype)


def _project(x, W_aug, a_aug, *, tm):
    N, Fin = x.shape
    H, _, Foutp1 = W_aug.shape
    return pl.pallas_call(
        _proj_kernel,
        out_shape=(jax.ShapeDtypeStruct((H, N, Foutp1), jnp.bfloat16),
                   jax.ShapeDtypeStruct((H, N, 2), jnp.float32)),
        grid=(N // tm, H),
        in_specs=[
            pl.BlockSpec((tm, Fin), lambda i, h: (i, 0)),          # x row tile (reused across heads)
            pl.BlockSpec((1, Fin, Foutp1), lambda i, h: (h, 0, 0)),  # per-head W_aug
            pl.BlockSpec((1, 2, Foutp1), lambda i, h: (h, 0, 0)),    # per-head [a1;a2] (padded)
        ],
        out_specs=(pl.BlockSpec((1, tm, Foutp1), lambda i, h: (h, i, 0)),
                   pl.BlockSpec((1, tm, 2), lambda i, h: (h, i, 0))),
        compiler_params=pltpu.CompilerParams(
            dimension_semantics=("parallel", "arbitrary"),
            vmem_limit_bytes=32 * 1024 * 1024),
    )(x, W_aug, a_aug)


# ---------------------------------------------------------------------------
# Kernel 2: fused masked attention + aggregation, online over neighbor tiles.
# Grid = (row tiles i, heads h, neighbor tiles j)  [j innermost = reduction].
#   s[i,j]   = f1[i] + f2[j]
#   e[i,j]   = exp(-leakyrelu(s)) * (adj[i,j] != 0)
#   acc      = sum_j e @ [h | 1]          (MXU; last column is the rowsum)
#   out[i]   = elu( acc[:, :F] / acc[:, F:] )
# ---------------------------------------------------------------------------
def _make_attn_kernel(alpha, concat, fout, elem_dtype):
    def attn_kernel(f1_ref, f2_ref, adj_ref, h_ref, out_ref, acc_ref):
        j = pl.program_id(2)

        @pl.when(j == 0)
        def _init():
            acc_ref[...] = jnp.zeros_like(acc_ref)

        # scores: f32 broadcast add, then a single cast (bf16 on v6e/v7x).
        s = f1_ref[0] + f2_ref[0]                     # (tm,1)+(1,tn) -> (tm,tn) f32
        s = s.astype(elem_dtype)
        arg = jnp.where(s > 0, -s, (-alpha) * s)      # -LeakyReLU_alpha(s)
        e = jnp.where(adj_ref[...] != 0, jnp.exp(arg), 0)
        e = e.astype(jnp.bfloat16)                    # MXU operand, f32 accumulation

        acc_ref[...] += jnp.dot(e, h_ref[0], preferred_element_type=jnp.float32)

        @pl.when(j == pl.num_programs(2) - 1)
        def _finalize():
            acc = acc_ref[...]
            # exact reciprocal: runs once per (row tile, head), cost is negligible.
            hp = acc[:, :fout] * pl.reciprocal(acc[:, fout:], approx=False)
            if concat:  # ELU
                hp = jnp.where(hp > 0, hp, jnp.expm1(jnp.minimum(hp, 0.0)))
            out_ref[0] = hp

    return attn_kernel


# ---------------------------------------------------------------------------
# Wrappers
# ---------------------------------------------------------------------------
def sp_gat_forward_multihead(x, adj, W, a, *, alpha, concat=True, tm=None, tn=None):
    """H fused independent SpGraphAttentionLayer heads sharing x and adj.

    W: (H, Fin, Fout), a: (H, 1, 2*Fout).  Returns (H, N, Fout) f32.
    Dropout on edge_e is treated as identity (eval semantics).
    """
    H, Fin, Fout = W.shape
    N = x.shape[0]
    assert a.shape == (H, 1, 2 * Fout)

    if tm is None:
        tm = (_pick_tile(N, (512, 256, 128), min_tiles=2)
              or _pick_tile(N, (512, 256, 128)))
    if tn is None:
        tn = _pick_tile(N, (2048, 1024, 512, 256, 128))
    if tm is None or tn is None or N % tm or N % tn:
        raise ValueError("N must be divisible by the chosen tiles "
                         "(multiples of 128); got N=%d tm=%s tn=%s" % (N, tm, tn))

    elem_dtype = _elementwise_dtype()

    # Parameter repacking: O(H*Fin*Fout) only, negligible.
    W_aug = jnp.pad(W.astype(jnp.float32), ((0, 0), (0, 0), (0, 1)))        # (H, Fin, Fout+1)
    a_stack = jnp.concatenate([a[:, :, :Fout], a[:, :, Fout:]], axis=1)     # (H, 2, Fout)
    a_aug = jnp.pad(a_stack.astype(jnp.float32), ((0, 0), (0, 0), (0, 1)))  # (H, 2, Fout+1)

    tm_lin = _pick_tile(N, (1024, 512, 256, 128)) or tm
    h_aug, f = _project(x.astype(jnp.float32), W_aug, a_aug, tm=tm_lin)

    # O(H*N) layout slices; negligible next to the O(N^2) attention stage.
    f1 = f[:, :, 0:1]                          # (H, N, 1)  row-side scores
    f2t = jnp.swapaxes(f[:, :, 1:2], 1, 2)     # (H, 1, N)  lane-dense column scores

    # adj handling: one-shot single head -> stream raw adj, compare in-kernel
    # (no extra HBM pass).  Multi-head -> int8 mask once, amortized over H heads.
    if H > 1 and adj.dtype.itemsize > 1:
        adj_in = (adj != 0).astype(jnp.int8)
    else:
        adj_in = adj

    Foutp1 = Fout + 1
    kernel = _make_attn_kernel(float(alpha), bool(concat), Fout, elem_dtype)
    out = pl.pallas_call(
        kernel,
        out_shape=jax.ShapeDtypeStruct((H, N, Fout), jnp.float32),
        grid=(N // tm, H, N // tn),
        in_specs=[
            pl.BlockSpec((1, tm, 1), lambda i, h, j: (h, i, 0)),        # f1 row tile
            pl.BlockSpec((1, 1, tn), lambda i, h, j: (h, 0, j)),        # f2 column tile
            pl.BlockSpec((tm, tn), lambda i, h, j: (i, j)),             # adj tile (raw/int8)
            pl.BlockSpec((1, tn, Foutp1), lambda i, h, j: (h, j, 0)),   # [h | 1] column tile
        ],
        out_specs=pl.BlockSpec((1, tm, Fout), lambda i, h, j: (h, i, 0)),
        scratch_shapes=[pltpu.VMEM((tm, Foutp1), jnp.float32)],         # e @ [h|1] accumulator
        compiler_params=pltpu.CompilerParams(
            dimension_semantics=("parallel", "parallel", "arbitrary"),
            # Kept <= 32 MiB so the same config fits v7x's 64 MiB physical VMEM.
            vmem_limit_bytes=32 * 1024 * 1024),
    )(f1, f2t, adj_in, h_aug)
    return out


def sp_gat_forward(x, adj, W, a, *, alpha, concat=True, tm=None, tn=None):
    """Forward pass of a single SpGraphAttentionLayer (dropout = identity)."""
    out = sp_gat_forward_multihead(x, adj, W[None], a[None],
                                   alpha=alpha, concat=concat, tm=tm, tn=tn)
    return out[0]


# ---------------------------------------------------------------------------
# Pure-JAX reference (mirrors the PyTorch forward, dropout = identity)
# ---------------------------------------------------------------------------
def ref_forward(x, adj, W, a, alpha, concat=True):
    h = x @ W
    F_ = h.shape[1]
    a1, a2 = a[:, :F_], a[:, F_:]
    s = (h @ a1.T) + (h @ a2.T).T
    s = jnp.where(s > 0, s, alpha * s)
    e = jnp.where(adj != 0, jnp.exp(-s), 0.0)
    rowsum = e.sum(axis=1, keepdims=True)
    hp = (e @ h) / rowsum
    if concat:
        hp = jnp.where(hp > 0, hp, jnp.expm1(jnp.minimum(hp, 0.0)))
    return hp


if __name__ == "__main__":
    N = 256               # number of graph nodes
    in_features = 32
    out_features = 16
    alpha = 0.2           # LeakyReLU negative slope
    gain = 1.414

    key = jax.random.PRNGKey(0)
    kx, kadj, kw, ka, kw2, ka2 = jax.random.split(key, 6)

    # Node features
    x = jax.random.normal(kx, (N, in_features), dtype=jnp.float32)

    # Random sparse adjacency with self-loops (avoids zero row-sums / NaNs,
    # matching the reference's implicit precondition).
    adj = (jax.random.uniform(kadj, (N, N)) < 0.10).astype(jnp.float32)
    adj = jnp.maximum(adj, jnp.eye(N, dtype=jnp.float32))

    # Deterministic xavier_normal_-style parameter init (gain=1.414)
    std_W = gain * np.sqrt(2.0 / (in_features + out_features))
    W = std_W * jax.random.normal(kw, (in_features, out_features), dtype=jnp.float32)
    std_a = gain * np.sqrt(2.0 / (1 + 2 * out_features))
    a = std_a * jax.random.normal(ka, (1, 2 * out_features), dtype=jnp.float32)

    # Tolerance: bf16 operands for e/h on the MXU (f32 accumulation); on v6e/v7x
    # the leakyrelu/exp additionally runs in bf16, so loosen slightly there.
    tol = 4e-2 if _elementwise_dtype() == jnp.bfloat16 else 3e-2

    # ----- single head: exact module semantics -----
    out = jax.block_until_ready(sp_gat_forward(x, adj, W, a, alpha=alpha))
    ref = jax.block_until_ready(ref_forward(x, adj, W, a, alpha))
    assert out.shape == (N, out_features)
    np.testing.assert_allclose(np.asarray(out), np.asarray(ref), rtol=tol, atol=tol)

    # ----- fused multi-head (H independent layers sharing adj) -----
    H = 4
    Wh = std_W * jax.random.normal(kw2, (H, in_features, out_features), dtype=jnp.float32)
    ah = std_a * jax.random.normal(ka2, (H, 1, 2 * out_features), dtype=jnp.float32)
    out_mh = jax.block_until_ready(
        sp_gat_forward_multihead(x, adj, Wh, ah, alpha=alpha))
    ref_mh = jnp.stack([ref_forward(x, adj, Wh[h], ah[h], alpha) for h in range(H)])
    ref_mh = jax.block_until_ready(ref_mh)
    assert out_mh.shape == (H, N, out_features)
    np.testing.assert_allclose(np.asarray(out_mh), np.asarray(ref_mh),
                               rtol=tol, atol=tol)

    print("KERNEL_OK")
</pallas_src>

<mosaic_0001>
module attributes {stable_mosaic.version = 11 : i64} {
  func.func @_proj_kernel(%arg0: i32, %arg1: i32, %arg2: memref<256x32xf32, #tpu.memory_space<vmem>>, %arg3: memref<1x32x17xf32, #tpu.memory_space<vmem>>, %arg4: memref<1x2x17xf32, #tpu.memory_space<vmem>>, %arg5: memref<1x256x17xbf16, #tpu.memory_space<vmem>>, %arg6: memref<1x256x2xf32, #tpu.memory_space<vmem>>) attributes {dimension_semantics = [#tpu.dimension_semantics<parallel>, #tpu.dimension_semantics<arbitrary>], iteration_bounds = array<i64: 1, 1>, scalar_prefetch = 0 : i64, scratch_operands = 0 : i64, tpu.core_type = #tpu.core_type<tc>, window_params = [{transform_indices = @transform_0, window_bounds = array<i64: 256, 32>}, {transform_indices = @transform_1, window_bounds = array<i64: 1, 32, 17>}, {transform_indices = @transform_2, window_bounds = array<i64: 1, 2, 17>}, {transform_indices = @transform_3, window_bounds = array<i64: 1, 256, 17>}, {transform_indices = @transform_4, window_bounds = array<i64: 1, 256, 2>}]} {
    %c0 = arith.constant 0 : index
    %c0_0 = arith.constant 0 : index
    %0 = vector.load %arg2[%c0, %c0_0] : memref<256x32xf32, #tpu.memory_space<vmem>>, vector<256x32xf32>
    %c0_1 = arith.constant 0 : index
    %c0_2 = arith.constant 0 : index
    %c0_3 = arith.constant 0 : index
    %1 = vector.load %arg3[%c0_1, %c0_2, %c0_3] : memref<1x32x17xf32, #tpu.memory_space<vmem>>, vector<1x32x17xf32>
    %2 = vector.shape_cast %1 : vector<1x32x17xf32> to vector<32x17xf32>
    %cst = arith.constant dense<0.000000e+00> : vector<256x17xf32>
    %3 = tpu.matmul %0, %2, %cst {dimension_numbers = #tpu.dot_dimension_numbers<[1], [0], [0], [1], [0, 0, 1, 1], [], []>} : vector<256x32xf32>, vector<32x17xf32>, vector<256x17xf32> -> vector<256x17xf32>
    %c0_4 = arith.constant 0 : index
    %c0_5 = arith.constant 0 : index
    %c0_6 = arith.constant 0 : index
    %4 = vector.load %arg4[%c0_4, %c0_5, %c0_6] : memref<1x2x17xf32, #tpu.memory_space<vmem>>, vector<1x2x17xf32>
    %5 = vector.shape_cast %4 : vector<1x2x17xf32> to vector<2x17xf32>
    %cst_7 = arith.constant dense<0.000000e+00> : vector<256x2xf32>
    %6 = tpu.matmul %3, %5, %cst_7 {dimension_numbers = #tpu.dot_dimension_numbers<[1], [1], [0], [0], [0, 0, 1, 0], [], []>} : vector<256x17xf32>, vector<2x17xf32>, vector<256x2xf32> -> vector<256x2xf32>
    %c0_8 = arith.constant 0 : index
    %c0_9 = arith.constant 0 : index
    %c0_10 = arith.constant 0 : index
    %7 = vector.load %arg6[%c0_8, %c0_9, %c0_10] : memref<1x256x2xf32, #tpu.memory_space<vmem>>, vector<1x256x2xf32>
    %8 = vector.shape_cast %7 : vector<1x256x2xf32> to vector<256x2xf32>
    %9 = vector.shape_cast %6 : vector<256x2xf32> to vector<1x256x2xf32>
    tpu.vector_store %arg6[%c0_8, %c0_9, %c0_10], %9 {strides = array<i32>} : memref<1x256x2xf32, #tpu.memory_space<vmem>>, vector<1x256x2xf32>,
    %10 = tpu.iota {dimensions = array<i32: 1>} : vector<256x17xi32>
    %c16_i32 = arith.constant 16 : i32
    %11 = vector.broadcast %c16_i32 : i32 to vector<256x17xi32>
    %12 = arith.cmpi eq, %10, %11 : vector<256x17xi32>
    %cst_11 = arith.constant 1.000000e+00 : f32
    %13 = vector.broadcast %cst_11 : f32 to vector<256x17xf32>
    %14 = arith.select %12, %13, %3 : vector<256x17xi1>, vector<256x17xf32>
    %15 = arith.truncf %14 : vector<256x17xf32> to vector<256x17xbf16>
    %c0_12 = arith.constant 0 : index
    %c0_13 = arith.constant 0 : index
    %c0_14 = arith.constant 0 : index
    %16 = vector.load %arg5[%c0_12, %c0_13, %c0_14] : memref<1x256x17xbf16, #tpu.memory_space<vmem>>, vector<1x256x17xbf16>
    %17 = vector.shape_cast %16 : vector<1x256x17xbf16> to vector<256x17xbf16>
    %18 = vector.shape_cast %15 : vector<256x17xbf16> to vector<1x256x17xbf16>
    tpu.vector_store %arg5[%c0_12, %c0_13, %c0_14], %18 {strides = array<i32>} : memref<1x256x17xbf16, #tpu.memory_space<vmem>>, vector<1x256x17xbf16>,
    return
  }
  func.func @transform_0(%arg0: i32, %arg1: i32) -> (i32, i32) {
    %c0_i32 = arith.constant 0 : i32
    %c0_i32_0 = arith.constant 0 : i32
    return %arg0, %c0_i32 : i32, i32
  }
  func.func @transform_1(%arg0: i32, %arg1: i32) -> (i32, i32, i32) {
    %c0_i32 = arith.constant 0 : i32
    %c0_i32_0 = arith.constant 0 : i32
    %c0_i32_1 = arith.constant 0 : i32
    return %arg1, %c0_i32, %c0_i32_0 : i32, i32, i32
  }
  func.func @transform_2(%arg0: i32, %arg1: i32) -> (i32, i32, i32) {
    %c0_i32 = arith.constant 0 : i32
    %c0_i32_0 = arith.constant 0 : i32
    %c0_i32_1 = arith.constant 0 : i32
    return %arg1, %c0_i32, %c0_i32_0 : i32, i32, i32
  }
  func.func @transform_3(%arg0: i32, %arg1: i32) -> (i32, i32, i32) {
    %c0_i32 = arith.constant 0 : i32
    %c0_i32_0 = arith.constant 0 : i32
    return %arg1, %arg0, %c0_i32 : i32, i32, i32
  }
  func.func @transform_4(%arg0: i32, %arg1: i32) -> (i32, i32, i32) {
    %c0_i32 = arith.constant 0 : i32
    %c0_i32_0 = arith.constant 0 : i32
    return %arg1, %arg0, %c0_i32 : i32, i32, i32
  }
}

</mosaic_0001>

<bundles_post_ra>
// kernel: tpu_custom_call.1
= control target key start
LH: loop header
LB: loop body
LE: loop exit
PB: predicated region body
PF: predicated region fallthrough
CT: control target
= control target key end

     0   :  { %vm52_vm0 = vcmask 261120   ;;  %vm375_vm1 = vcmask 138240   ;;  %v733_v37 = vlaneseq  ;;  %vm896_vm3 = vcmask 134144   ;;  %s1766_s1 = inlined_call_operand.vmem [shape: f32[1,32,17], index: 1, kind: input, shape index: {}]   ;;  %s1767_s0 = inlined_call_operand.vmem [shape: f32[256,32], index: 0, kind: input, shape index: {}]   ;;  %s1768_s2 = inlined_call_operand.vmem [shape: f32[1,2,17], index: 2, kind: input, shape index: {}]   ;;  %s1769_s3 = inlined_call_operand.vmem [shape: bf16[1,256,17], index: 3, kind: output, shape index: {0}]   ;;  %s1770_s4 = inlined_call_operand.vmem [shape: f32[1,256,2], index: 4, kind: output, shape index: {1}]  }
   0x1   :  { %v51_v0 = vld [vmem:[%s1766_s1 + $0x18] sm:$0xff]  ;;  %v50_v1 = vld [vmem:[%s1766_s1 + $0x10] sm:$0xff]  ;;  %v16_v2 = vld [vmem:[%s1767_s0] sm:$0xff]  ;;  %vm700_vm4 = vcmask 15360  }
   0x2   :  { %1135 = vmatprep.subr.mxu0 %v51_v0  ;;  %v49_v3 = vld [vmem:[%s1766_s1 + $0x8] sm:$0xff]  ;;  %1143 = vmatprep.mubr.msk.f32.mxu0 %vm52_vm0, %v16_v2  ;;  %v48_v4 = vld [vmem:[%s1766_s1] sm:$0xff]  ;;  %v18_v6 = vld [vmem:[%s1767_s0 + $0x10] sm:$0xff]  ;;  %v1411_v38 = vand.u32 127, %v733_v37 }
   0x3   :  { %1136 = vmatpush3.msra.mxu0 %v51_v0  ;;  %v17_v5 = vld [vmem:[%s1767_s0 + $0x8] sm:$0xff]  ;;  %v19_v7 = vld [vmem:[%s1767_s0 + $0x18] sm:$0xff]  ;;  %v20_v8 = vld [vmem:[%s1767_s0 + $0x20] sm:$0xff] }
   0x4   :  { %1137 = vmatprep.subr.mxu0 %v50_v1  ;;  %v21_v9 = vld [vmem:[%s1767_s0 + $0x28] sm:$0xff]  ;;  %v22_v10 = vld [vmem:[%s1767_s0 + $0x30] sm:$0xff]  ;;  %v23_v11 = vld [vmem:[%s1767_s0 + $0x38] sm:$0xff]  ;;  %vm735_vm2 = vcmp.eq.s32.totalorder %v1411_v38, 16 }
   0x5   :  { %1138 = vmatpush3.msra.mxu0 %v50_v1  ;;  %v24_v12 = vld [vmem:[%s1767_s0 + $0x40] sm:$0xff]  ;;  %v25_v13 = vld [vmem:[%s1767_s0 + $0x48] sm:$0xff]  ;;  %v26_v14 = vld [vmem:[%s1767_s0 + $0x50] sm:$0xff] }
   0x6   :  { %1139 = vmatprep.subr.mxu0 %v49_v3  ;;  %v27_v15 = vld [vmem:[%s1767_s0 + $0x58] sm:$0xff]  ;;  %v28_v16 = vld [vmem:[%s1767_s0 + $0x60] sm:$0xff]  ;;  %v29_v17 = vld [vmem:[%s1767_s0 + $0x68] sm:$0xff] }
   0x7   :  { %1140 = vmatpush3.msra.mxu0 %v49_v3  ;;  %v30_v18 = vld [vmem:[%s1767_s0 + $0x70] sm:$0xff]  ;;  %v31_v19 = vld [vmem:[%s1767_s0 + $0x78] sm:$0xff]  ;;  %v32_v20 = vld [vmem:[%s1767_s0 + $0x80] sm:$0xff] }
   0x8   :  { %1141 = vmatprep.subr.mxu0 %v48_v4  ;;  %v33_v21 = vld [vmem:[%s1767_s0 + $0x88] sm:$0xff]  ;;  %v34_v22 = vld [vmem:[%s1767_s0 + $0x90] sm:$0xff]  ;;  %v35_v23 = vld [vmem:[%s1767_s0 + $0x98] sm:$0xff] }
   0x9   :  { %1142 = vmatpush3.msra.mxu0 %v48_v4  ;;  %v36_v24 = vld [vmem:[%s1767_s0 + $0xa0] sm:$0xff]  ;;  %v37_v25 = vld [vmem:[%s1767_s0 + $0xa8] sm:$0xff]  ;;  %v38_v26 = vld [vmem:[%s1767_s0 + $0xb0] sm:$0xff] }
   0xa   :  { %1144 = vmatmul.mubr.msk.f32.vlgmr.msra.gmra.mxu0 %vm52_vm0, %v17_v5  ;;  %v39_v27 = vld [vmem:[%s1767_s0 + $0xb8] sm:$0xff]  ;;  %v40_v28 = vld [vmem:[%s1767_s0 + $0xc0] sm:$0xff]  ;;  %v41_v29 = vld [vmem:[%s1767_s0 + $0xc8] sm:$0xff] }
   0xb   :  { %1146 = vmatprep.mubr.msk.f32.mxu0 %vm52_vm0, %v18_v6  ;;  %v42_v30 = vld [vmem:[%s1767_s0 + $0xd0] sm:$0xff]  ;;  %v43_v31 = vld [vmem:[%s1767_s0 + $0xd8] sm:$0xff]  ;;  %v44_v32 = vld [vmem:[%s1767_s0 + $0xe0] sm:$0xff] }
   0xc   :  { %v45_v33 = vld [vmem:[%s1767_s0 + $0xe8] sm:$0xff]  ;;  %v46_v34 = vld [vmem:[%s1767_s0 + $0xf0] sm:$0xff]  ;;  %v47_v35 = vld [vmem:[%s1767_s0 + $0xf8] sm:$0xff] }
   0xd   :  { %v374_v36 = vld [vmem:[%s1768_s2] sm:$0x3] }
   0xe   :  { %1147 = vmatmul.mubr.msk.f32.gmra.mxu0 %vm52_vm0, %v19_v7  ;;  %1191 = vmatprep.subr.msk.mxu1 %vm375_vm1, %v374_v36 }
   0xf   :  { %1149 = vmatprep.mubr.msk.f32.mxu0 %vm52_vm0, %v20_v8  ;;  %1192 = vmatpush3.xpose.msk.msra.mxu1 %vm375_vm1, %v374_v36 }
  0x12   :  { %1150 = vmatmul.mubr.msk.f32.gmra.mxu0 %vm52_vm0, %v21_v9 }
  0x13   :  { %1152 = vmatprep.mubr.msk.f32.mxu0 %vm52_vm0, %v22_v10 }
  0x16   :  { %1153 = vmatmul.mubr.msk.f32.gmra.mxu0 %vm52_vm0, %v23_v11 }
  0x17   :  { %1155 = vmatprep.mubr.msk.f32.mxu0 %vm52_vm0, %v24_v12 }
  0x1a   :  { %1156 = vmatmul.mubr.msk.f32.gmra.mxu0 %vm52_vm0, %v25_v13 }
  0x1b   :  { %1158 = vmatprep.mubr.msk.f32.mxu0 %vm52_vm0, %v26_v14 }
  0x1e   :  { %1159 = vmatmul.mubr.msk.f32.gmra.mxu0 %vm52_vm0, %v27_v15 }
  0x1f   :  { %1161 = vmatprep.mubr.msk.f32.mxu0 %vm52_vm0, %v28_v16 }
  0x22   :  { %1162 = vmatmul.mubr.msk.f32.gmra.mxu0 %vm52_vm0, %v29_v17 }
  0x23   :  { %1164 = vmatprep.mubr.msk.f32.mxu0 %vm52_vm0, %v30_v18 }
  0x26   :  { %1165 = vmatmul.mubr.msk.f32.gmra.mxu0 %vm52_vm0, %v31_v19 }
  0x27   :  { %1167 = vmatprep.mubr.msk.f32.mxu0 %vm52_vm0, %v32_v20 }
  0x2a   :  { %1168 = vmatmul.mubr.msk.f32.gmra.mxu0 %vm52_vm0, %v33_v21 }
  0x2b   :  { %1170 = vmatprep.mubr.msk.f32.mxu0 %vm52_vm0, %v34_v22 }
  0x2e   :  { %1171 = vmatmul.mubr.msk.f32.gmra.mxu0 %vm52_vm0, %v35_v23 }
  0x2f   :  { %1173 = vmatprep.mubr.msk.f32.mxu0 %vm52_vm0, %v36_v24 }
  0x32   :  { %1174 = vmatmul.mubr.msk.f32.gmra.mxu0 %vm52_vm0, %v37_v25 }
  0x33   :  { %1176 = vmatprep.mubr.msk.f32.mxu0 %vm52_vm0, %v38_v26 }
  0x36   :  { %1177 = vmatmul.mubr.msk.f32.gmra.mxu0 %vm52_vm0, %v39_v27 }
  0x37   :  { %1179 = vmatprep.mubr.msk.f32.mxu0 %vm52_vm0, %v40_v28 }
  0x3a   :  { %1180 = vmatmul.mubr.msk.f32.gmra.mxu0 %vm52_vm0, %v41_v29 }
  0x3b   :  { %1182 = vmatprep.mubr.msk.f32.mxu0 %vm52_vm0, %v42_v30 }
  0x3e   :  { %1183 = vmatmul.mubr.msk.f32.gmra.mxu0 %vm52_vm0, %v43_v31 }
  0x3f   :  { %1185 = vmatprep.mubr.msk.f32.mxu0 %vm52_vm0, %v44_v32 }
  0x42   :  { %1186 = vmatmul.mubr.msk.f32.gmra.mxu0 %vm52_vm0, %v45_v33 }
  0x43   :  { %1188 = vmatprep.mubr.msk.f32.mxu0 %vm52_vm0, %v46_v34 }
  0x46   :  { %1189 = vmatmul.mubr.msk.f32.gmra.mxu0 %vm52_vm0, %v47_v35 }
  0xca   :  { %v1145_v39 = vpop.f32.mrf.mxu0 }
  0xcb   :  { %v737_v40 = vsel %vm735_vm2, 1.0, %v1145_v39 }
  0xcc   :  { %v1035_v41 = vpack.c.bf16 %v737_v40, %v737_v40  ;;  %v215_v42 = vpop.f32.mrf.mxu0 }
  0xcd   :  { %v736_v43 = vsel %vm735_vm2, 1.0, %v215_v42  ;;  %1193 = vmatprep.mubr.msk.f32.mxu1 %vm375_vm1, %v215_v42 }
  0xce   :  { %898 = vst.msk [vmem:[%s1769_s3 + $0x4] sm:$0xf] %vm896_vm3, %v1035_v41  ;;  %v1034_v44 = vpack.c.bf16 %v736_v43, %v736_v43  ;;  %v1148_v45 = vpop.f32.mrf.mxu0  ;;  %1194 = vmatmul.mubr.msk.f32.vlgmr.msra.gmra.mxu1 %vm375_vm1, %v1145_v39 }
  0xcf   :  { %v739_v46 = vsel %vm735_vm2, 1.0, %v1148_v45 }
  0xd0   :  { %897 = vst.msk [vmem:[%s1769_s3] sm:$0xf] %vm896_vm3, %v1034_v44  ;;  %v1037_v47 = vpack.c.bf16 %v739_v46, %v739_v46  ;;  %v225_v48 = vpop.f32.mrf.mxu0 }
  0xd1   :  { %v738_v49 = vsel %vm735_vm2, 1.0, %v225_v48  ;;  %1196 = vmatprep.mubr.msk.f32.mxu1 %vm375_vm1, %v225_v48 }
  0xd2   :  { %900 = vst.msk [vmem:[%s1769_s3 + $0xc] sm:$0xf] %vm896_vm3, %v1037_v47  ;;  %v1036_v50 = vpack.c.bf16 %v738_v49, %v738_v49  ;;  %v1151_v51 = vpop.f32.mrf.mxu0  ;;  %1197 = vmatmul.mubr.msk.f32.gmra.mxu1 %vm375_vm1, %v1148_v45 }
  0xd3   :  { %v741_v52 = vsel %vm735_vm2, 1.0, %v1151_v51 }
  0xd4   :  { %899 = vst.msk [vmem:[%s1769_s3 + $0x8] sm:$0xf] %vm896_vm3, %v1036_v50  ;;  %v1039_v53 = vpack.c.bf16 %v741_v52, %v741_v52  ;;  %v235_v54 = vpop.f32.mrf.mxu0 }
  0xd5   :  { %v740_v55 = vsel %vm735_vm2, 1.0, %v235_v54  ;;  %1199 = vmatprep.mubr.msk.f32.mxu1 %vm375_vm1, %v235_v54 }
  0xd6   :  { %902 = vst.msk [vmem:[%s1769_s3 + $0x14] sm:$0xf] %vm896_vm3, %v1039_v53  ;;  %v1038_v56 = vpack.c.bf16 %v740_v55, %v740_v55  ;;  %v1154_v57 = vpop.f32.mrf.mxu0  ;;  %1200 = vmatmul.mubr.msk.f32.gmra.mxu1 %vm375_vm1, %v1151_v51 }
  0xd7   :  { %v743_v58 = vsel %vm735_vm2, 1.0, %v1154_v57 }
  0xd8   :  { %901 = vst.msk [vmem:[%s1769_s3 + $0x10] sm:$0xf] %vm896_vm3, %v1038_v56  ;;  %v1041_v59 = vpack.c.bf16 %v743_v58, %v743_v58  ;;  %v245_v60 = vpop.f32.mrf.mxu0 }
  0xd9   :  { %v742_v61 = vsel %vm735_vm2, 1.0, %v245_v60  ;;  %1202 = vmatprep.mubr.msk.f32.mxu1 %vm375_vm1, %v245_v60 }
  0xda   :  { %904 = vst.msk [vmem:[%s1769_s3 + $0x1c] sm:$0xf] %vm896_vm3, %v1041_v59  ;;  %v1040_v62 = vpack.c.bf16 %v742_v61, %v742_v61  ;;  %v1157_v63 = vpop.f32.mrf.mxu0  ;;  %1203 = vmatmul.mubr.msk.f32.gmra.mxu1 %vm375_vm1, %v1154_v57 }
  0xdb   :  { %v745_v0 = vsel %vm735_vm2, 1.0, %v1157_v63 }
  0xdc   :  { %903 = vst.msk [vmem:[%s1769_s3 + $0x18] sm:$0xf] %vm896_vm3, %v1040_v62  ;;  %v1043_v1 = vpack.c.bf16 %v745_v0, %v745_v0  ;;  %v255_v2 = vpop.f32.mrf.mxu0 }
  0xdd   :  { %v744_v3 = vsel %vm735_vm2, 1.0, %v255_v2  ;;  %1205 = vmatprep.mubr.msk.f32.mxu1 %vm375_vm1, %v255_v2 }
  0xde   :  { %906 = vst.msk [vmem:[%s1769_s3 + $0x24] sm:$0xf] %vm896_vm3, %v1043_v1  ;;  %v1042_v4 = vpack.c.bf16 %v744_v3, %v744_v3  ;;  %v1160_v5 = vpop.f32.mrf.mxu0  ;;  %1206 = vmatmul.mubr.msk.f32.gmra.mxu1 %vm375_vm1, %v1157_v63 }
  0xdf   :  { %v747_v6 = vsel %vm735_vm2, 1.0, %v1160_v5 }
  0xe0   :  { %905 = vst.msk [vmem:[%s1769_s3 + $0x20] sm:$0xf] %vm896_vm3, %v1042_v4  ;;  %v1045_v7 = vpack.c.bf16 %v747_v6, %v747_v6  ;;  %v265_v8 = vpop.f32.mrf.mxu0 }
  0xe1   :  { %v746_v9 = vsel %vm735_vm2, 1.0, %v265_v8  ;;  %1208 = vmatprep.mubr.msk.f32.mxu1 %vm375_vm1, %v265_v8 }
  0xe2   :  { %908 = vst.msk [vmem:[%s1769_s3 + $0x2c] sm:$0xf] %vm896_vm3, %v1045_v7  ;;  %v1044_v10 = vpack.c.bf16 %v746_v9, %v746_v9  ;;  %v1163_v11 = vpop.f32.mrf.mxu0  ;;  %1209 = vmatmul.mubr.msk.f32.gmra.mxu1 %vm375_vm1, %v1160_v5 }
  0xe3   :  { %v749_v12 = vsel %vm735_vm2, 1.0, %v1163_v11 }
  0xe4   :  { %907 = vst.msk [vmem:[%s1769_s3 + $0x28] sm:$0xf] %vm896_vm3, %v1044_v10  ;;  %v1047_v13 = vpack.c.bf16 %v749_v12, %v749_v12  ;;  %v275_v14 = vpop.f32.mrf.mxu0 }
  0xe5   :  { %v748_v15 = vsel %vm735_vm2, 1.0, %v275_v14  ;;  %1211 = vmatprep.mubr.msk.f32.mxu1 %vm375_vm1, %v275_v14 }
  0xe6   :  { %910 = vst.msk [vmem:[%s1769_s3 + $0x34] sm:$0xf] %vm896_vm3, %v1047_v13  ;;  %v1046_v16 = vpack.c.bf16 %v748_v15, %v748_v15  ;;  %v1166_v17 = vpop.f32.mrf.mxu0  ;;  %1212 = vmatmul.mubr.msk.f32.gmra.mxu1 %vm375_vm1, %v1163_v11 }
  0xe7   :  { %v751_v18 = vsel %vm735_vm2, 1.0, %v1166_v17 }
  0xe8   :  { %909 = vst.msk [vmem:[%s1769_s3 + $0x30] sm:$0xf] %vm896_vm3, %v1046_v16  ;;  %v1049_v19 = vpack.c.bf16 %v751_v18, %v751_v18  ;;  %v285_v20 = vpop.f32.mrf.mxu0 }
  0xe9   :  { %v750_v21 = vsel %vm735_vm2, 1.0, %v285_v20  ;;  %1214 = vmatprep.mubr.msk.f32.mxu1 %vm375_vm1, %v285_v20 }
  0xea   :  { %912 = vst.msk [vmem:[%s1769_s3 + $0x3c] sm:$0xf] %vm896_vm3, %v1049_v19  ;;  %v1048_v22 = vpack.c.bf16 %v750_v21, %v750_v21  ;;  %v1169_v23 = vpop.f32.mrf.mxu0  ;;  %1215 = vmatmul.mubr.msk.f32.gmra.mxu1 %vm375_vm1, %v1166_v17 }
  0xeb   :  { %v753_v24 = vsel %vm735_vm2, 1.0, %v1169_v23 }
  0xec   :  { %911 = vst.msk [vmem:[%s1769_s3 + $0x38] sm:$0xf] %vm896_vm3, %v1048_v22  ;;  %v1051_v25 = vpack.c.bf16 %v753_v24, %v753_v24  ;;  %v295_v26 = vpop.f32.mrf.mxu0 }
  0xed   :  { %v752_v27 = vsel %vm735_vm2, 1.0, %v295_v26  ;;  %1217 = vmatprep.mubr.msk.f32.mxu1 %vm375_vm1, %v295_v26 }
  0xee   :  { %914 = vst.msk [vmem:[%s1769_s3 + $0x44] sm:$0xf] %vm896_vm3, %v1051_v25  ;;  %v1050_v28 = vpack.c.bf16 %v752_v27, %v752_v27  ;;  %v1172_v29 = vpop.f32.mrf.mxu0  ;;  %1218 = vmatmul.mubr.msk.f32.gmra.mxu1 %vm375_vm1, %v1169_v23 }
  0xef   :  { %v755_v30 = vsel %vm735_vm2, 1.0, %v1172_v29 }
  0xf0   :  { %913 = vst.msk [vmem:[%s1769_s3 + $0x40] sm:$0xf] %vm896_vm3, %v1050_v28  ;;  %v1053_v31 = vpack.c.bf16 %v755_v30, %v755_v30  ;;  %v305_v32 = vpop.f32.mrf.mxu0 }
  0xf1   :  { %v754_v33 = vsel %vm735_vm2, 1.0, %v305_v32  ;;  %1220 = vmatprep.mubr.msk.f32.mxu1 %vm375_vm1, %v305_v32 }
  0xf2   :  { %916 = vst.msk [vmem:[%s1769_s3 + $0x4c] sm:$0xf] %vm896_vm3, %v1053_v31  ;;  %v1052_v34 = vpack.c.bf16 %v754_v33, %v754_v33  ;;  %v1175_v35 = vpop.f32.mrf.mxu0  ;;  %1221 = vmatmul.mubr.msk.f32.gmra.mxu1 %vm375_vm1, %v1172_v29 }
  0xf3   :  { %v757_v36 = vsel %vm735_vm2, 1.0, %v1175_v35 }
  0xf4   :  { %915 = vst.msk [vmem:[%s1769_s3 + $0x48] sm:$0xf] %vm896_vm3, %v1052_v34  ;;  %v1055_v37 = vpack.c.bf16 %v757_v36, %v757_v36  ;;  %v315_v39 = vpop.f32.mrf.mxu0 }
  0xf5   :  { %v756_v40 = vsel %vm735_vm2, 1.0, %v315_v39  ;;  %1223 = vmatprep.mubr.msk.f32.mxu1 %vm375_vm1, %v315_v39 }
  0xf6   :  { %918 = vst.msk [vmem:[%s1769_s3 + $0x54] sm:$0xf] %vm896_vm3, %v1055_v37  ;;  %v1054_v41 = vpack.c.bf16 %v756_v40, %v756_v40  ;;  %v1178_v42 = vpop.f32.mrf.mxu0  ;;  %1224 = vmatmul.mubr.msk.f32.gmra.mxu1 %vm375_vm1, %v1175_v35 }
  0xf7   :  { %v759_v43 = vsel %vm735_vm2, 1.0, %v1178_v42 }
  0xf8   :  { %917 = vst.msk [vmem:[%s1769_s3 + $0x50] sm:$0xf] %vm896_vm3, %v1054_v41  ;;  %v1057_v44 = vpack.c.bf16 %v759_v43, %v759_v43  ;;  %v325_v45 = vpop.f32.mrf.mxu0 }
  0xf9   :  { %v758_v46 = vsel %vm735_vm2, 1.0, %v325_v45  ;;  %1226 = vmatprep.mubr.msk.f32.mxu1 %vm375_vm1, %v325_v45 }
  0xfa   :  { %920 = vst.msk [vmem:[%s1769_s3 + $0x5c] sm:$0xf] %vm896_vm3, %v1057_v44  ;;  %v1056_v47 = vpack.c.bf16 %v758_v46, %v758_v46  ;;  %v1181_v48 = vpop.f32.mrf.mxu0  ;;  %1227 = vmatmul.mubr.msk.f32.gmra.mxu1 %vm375_vm1, %v1178_v42 }
  0xfb   :  { %v761_v49 = vsel %vm735_vm2, 1.0, %v1181_v48 }
  0xfc   :  { %919 = vst.msk [vmem:[%s1769_s3 + $0x58] sm:$0xf] %vm896_vm3, %v1056_v47  ;;  %v1059_v50 = vpack.c.bf16 %v761_v49, %v761_v49  ;;  %v335_v51 = vpop.f32.mrf.mxu0 }
  0xfd   :  { %v760_v52 = vsel %vm735_vm2, 1.0, %v335_v51  ;;  %1229 = vmatprep.mubr.msk.f32.mxu1 %vm375_vm1, %v335_v51 }
  0xfe   :  { %922 = vst.msk [vmem:[%s1769_s3 + $0x64] sm:$0xf] %vm896_vm3, %v1059_v50  ;;  %v1058_v53 = vpack.c.bf16 %v760_v52, %v760_v52  ;;  %v1184_v54 = vpop.f32.mrf.mxu0  ;;  %1230 = vmatmul.mubr.msk.f32.gmra.mxu1 %vm375_vm1, %v1181_v48 }
  0xff   :  { %v763_v55 = vsel %vm735_vm2, 1.0, %v1184_v54 }
 0x100   :  { %921 = vst.msk [vmem:[%s1769_s3 + $0x60] sm:$0xf] %vm896_vm3, %v1058_v53  ;;  %v1061_v56 = vpack.c.bf16 %v763_v55, %v763_v55  ;;  %v345_v57 = vpop.f32.mrf.mxu0 }
 0x101   :  { %v762_v58 = vsel %vm735_vm2, 1.0, %v345_v57  ;;  %1232 = vmatprep.mubr.msk.f32.mxu1 %vm375_vm1, %v345_v57 }
 0x102   :  { %924 = vst.msk [vmem:[%s1769_s3 + $0x6c] sm:$0xf] %vm896_vm3, %v1061_v56  ;;  %v1060_v59 = vpack.c.bf16 %v762_v58, %v762_v58  ;;  %v1187_v60 = vpop.f32.mrf.mxu0  ;;  %1233 = vmatmul.mubr.msk.f32.gmra.mxu1 %vm375_vm1, %v1184_v54 }
 0x103   :  { %v765_v61 = vsel %vm735_vm2, 1.0, %v1187_v60 }
 0x104   :  { %923 = vst.msk [vmem:[%s1769_s3 + $0x68] sm:$0xf] %vm896_vm3, %v1060_v59  ;;  %v1063_v62 = vpack.c.bf16 %v765_v61, %v765_v61  ;;  %v355_v63 = vpop.f32.mrf.mxu0 }
 0x105   :  { %v764_v0 = vsel %vm735_vm2, 1.0, %v355_v63  ;;  %1235 = vmatprep.mubr.msk.f32.mxu1 %vm375_vm1, %v355_v63 }
 0x106   :  { %926 = vst.msk [vmem:[%s1769_s3 + $0x74] sm:$0xf] %vm896_vm3, %v1063_v62  ;;  %v1062_v1 = vpack.c.bf16 %v764_v0, %v764_v0  ;;  %v1190_v2 = vpop.f32.mrf.mxu0  ;;  %1236 = vmatmul.mubr.msk.f32.gmra.mxu1 %vm375_vm1, %v1187_v60 }
 0x107   :  { %v767_v3 = vsel %vm735_vm2, 1.0, %v1190_v2 }
 0x108   :  { %925 = vst.msk [vmem:[%s1769_s3 + $0x70] sm:$0xf] %vm896_vm3, %v1062_v1  ;;  %v1065_v4 = vpack.c.bf16 %v767_v3, %v767_v3  ;;  %v365_v5 = vpop.f32.mrf.mxu0 }
 0x109   :  { %v766_v6 = vsel %vm735_vm2, 1.0, %v365_v5  ;;  %1238 = vmatprep.mubr.msk.f32.mxu1 %vm375_vm1, %v365_v5 }
 0x10a   :  { %928 = vst.msk [vmem:[%s1769_s3 + $0x7c] sm:$0xf] %vm896_vm3, %v1065_v4  ;;  %v1064_v7 = vpack.c.bf16 %v766_v6, %v766_v6  ;;  %1239 = vmatmul.mubr.msk.f32.gmra.mxu1 %vm375_vm1, %v1190_v2 }
 0x10c   :  { %927 = vst.msk [vmem:[%s1769_s3 + $0x78] sm:$0xf] %vm896_vm3, %v1064_v7 }
 0x18e   :  { %v1195_v8 = vpop.f32.mrf.mxu1 }
 0x18f   :  { %702 = vst.msk [vmem:[%s1770_s4 + $0x8] sm:$0xff] %vm700_vm4, %v1195_v8 }
 0x190   :  { %v541_v38 = vpop.f32.mrf.mxu1 }
 0x191   :  { %701 = vst.msk [vmem:[%s1770_s4] sm:$0xff] %vm700_vm4, %v541_v38 }
 0x192   :  { %v1198_v9 = vpop.f32.mrf.mxu1 }
 0x193   :  { %704 = vst.msk [vmem:[%s1770_s4 + $0x18] sm:$0xff] %vm700_vm4, %v1198_v9 }
 0x194   :  { %v551_v10 = vpop.f32.mrf.mxu1 }
 0x195   :  { %703 = vst.msk [vmem:[%s1770_s4 + $0x10] sm:$0xff] %vm700_vm4, %v551_v10 }
 0x196   :  { %v1201_v11 = vpop.f32.mrf.mxu1 }
 0x197   :  { %706 = vst.msk [vmem:[%s1770_s4 + $0x28] sm:$0xff] %vm700_vm4, %v1201_v11 }
 0x198   :  { %v561_v12 = vpop.f32.mrf.mxu1 }
 0x199   :  { %705 = vst.msk [vmem:[%s1770_s4 + $0x20] sm:$0xff] %vm700_vm4, %v561_v12 }
 0x19a   :  { %v1204_v13 = vpop.f32.mrf.mxu1 }
 0x19b   :  { %708 = vst.msk [vmem:[%s1770_s4 + $0x38] sm:$0xff] %vm700_vm4, %v1204_v13 }
 0x19c   :  { %v571_v14 = vpop.f32.mrf.mxu1 }
 0x19d   :  { %707 = vst.msk [vmem:[%s1770_s4 + $0x30] sm:$0xff] %vm700_vm4, %v571_v14 }
 0x19e   :  { %v1207_v15 = vpop.f32.mrf.mxu1 }
 0x19f   :  { %710 = vst.msk [vmem:[%s1770_s4 + $0x48] sm:$0xff] %vm700_vm4, %v1207_v15 }
 0x1a0   :  { %v581_v16 = vpop.f32.mrf.mxu1 }
 0x1a1   :  { %709 = vst.msk [vmem:[%s1770_s4 + $0x40] sm:$0xff] %vm700_vm4, %v581_v16 }
 0x1a2   :  { %v1210_v17 = vpop.f32.mrf.mxu1 }
 0x1a3   :  { %712 = vst.msk [vmem:[%s1770_s4 + $0x58] sm:$0xff] %vm700_vm4, %v1210_v17 }
 0x1a4   :  { %v591_v18 = vpop.f32.mrf.mxu1 }
 0x1a5   :  { %711 = vst.msk [vmem:[%s1770_s4 + $0x50] sm:$0xff] %vm700_vm4, %v591_v18 }
 0x1a6   :  { %v1213_v19 = vpop.f32.mrf.mxu1 }
 0x1a7   :  { %714 = vst.msk [vmem:[%s1770_s4 + $0x68] sm:$0xff] %vm700_vm4, %v1213_v19 }
 0x1a8   :  { %v601_v20 = vpop.f32.mrf.mxu1 }
 0x1a9   :  { %713 = vst.msk [vmem:[%s1770_s4 + $0x60] sm:$0xff] %vm700_vm4, %v601_v20 }
 0x1aa   :  { %v1216_v21 = vpop.f32.mrf.mxu1 }
 0x1ab   :  { %716 = vst.msk [vmem:[%s1770_s4 + $0x78] sm:$0xff] %vm700_vm4, %v1216_v21 }
 0x1ac   :  { %v611_v22 = vpop.f32.mrf.mxu1 }
 0x1ad   :  { %715 = vst.msk [vmem:[%s1770_s4 + $0x70] sm:$0xff] %vm700_vm4, %v611_v22 }
 0x1ae   :  { %v1219_v23 = vpop.f32.mrf.mxu1 }
 0x1af   :  { %718 = vst.msk [vmem:[%s1770_s4 + $0x88] sm:$0xff] %vm700_vm4, %v1219_v23 }
 0x1b0   :  { %v621_v24 = vpop.f32.mrf.mxu1 }
 0x1b1   :  { %717 = vst.msk [vmem:[%s1770_s4 + $0x80] sm:$0xff] %vm700_vm4, %v621_v24 }
 0x1b2   :  { %v1222_v25 = vpop.f32.mrf.mxu1 }
 0x1b3   :  { %720 = vst.msk [vmem:[%s1770_s4 + $0x98] sm:$0xff] %vm700_vm4, %v1222_v25 }
 0x1b4   :  { %v631_v26 = vpop.f32.mrf.mxu1 }
 0x1b5   :  { %719 = vst.msk [vmem:[%s1770_s4 + $0x90] sm:$0xff] %vm700_vm4, %v631_v26 }
 0x1b6   :  { %v1225_v27 = vpop.f32.mrf.mxu1 }
 0x1b7   :  { %722 = vst.msk [vmem:[%s1770_s4 + $0xa8] sm:$0xff] %vm700_vm4, %v1225_v27 }
 0x1b8   :  { %v641_v28 = vpop.f32.mrf.mxu1 }
 0x1b9   :  { %721 = vst.msk [vmem:[%s1770_s4 + $0xa0] sm:$0xff] %vm700_vm4, %v641_v28 }
 0x1ba   :  { %v1228_v29 = vpop.f32.mrf.mxu1 }
 0x1bb   :  { %724 = vst.msk [vmem:[%s1770_s4 + $0xb8] sm:$0xff] %vm700_vm4, %v1228_v29 }
 0x1bc   :  { %v651_v30 = vpop.f32.mrf.mxu1 }
 0x1bd   :  { %723 = vst.msk [vmem:[%s1770_s4 + $0xb0] sm:$0xff] %vm700_vm4, %v651_v30 }
 0x1be   :  { %v1231_v31 = vpop.f32.mrf.mxu1 }
 0x1bf   :  { %726 = vst.msk [vmem:[%s1770_s4 + $0xc8] sm:$0xff] %vm700_vm4, %v1231_v31 }
 0x1c0   :  { %v661_v32 = vpop.f32.mrf.mxu1 }
 0x1c1   :  { %725 = vst.msk [vmem:[%s1770_s4 + $0xc0] sm:$0xff] %vm700_vm4, %v661_v32 }
 0x1c2   :  { %v1234_v33 = vpop.f32.mrf.mxu1 }
 0x1c3   :  { %728 = vst.msk [vmem:[%s1770_s4 + $0xd8] sm:$0xff] %vm700_vm4, %v1234_v33 }
 0x1c4   :  { %v671_v34 = vpop.f32.mrf.mxu1 }
 0x1c5   :  { %727 = vst.msk [vmem:[%s1770_s4 + $0xd0] sm:$0xff] %vm700_vm4, %v671_v34 }
 0x1c6   :  { %v1237_v35 = vpop.f32.mrf.mxu1 }
 0x1c7   :  { %730 = vst.msk [vmem:[%s1770_s4 + $0xe8] sm:$0xff] %vm700_vm4, %v1237_v35 }
 0x1c8   :  { %v681_v36 = vpop.f32.mrf.mxu1 }
 0x1c9   :  { %729 = vst.msk [vmem:[%s1770_s4 + $0xe0] sm:$0xff] %vm700_vm4, %v681_v36 }
 0x1ca   :  { %v1240_v37 = vpop.f32.mrf.mxu1 }
 0x1cb   :  { %732 = vst.msk [vmem:[%s1770_s4 + $0xf8] sm:$0xff] %vm700_vm4, %v1240_v37 }
 0x1cc   :  { %v691_v39 = vpop.f32.mrf.mxu1 }
 0x1cd   :  { %731 = vst.msk [vmem:[%s1770_s4 + $0xf0] sm:$0xff] %vm700_vm4, %v691_v39 }

</bundles_post_ra>
